<compile_context>
chip_gen: v6e
topology: v6e:2x2x1
jax: 0.10.0
libtpu: 0.0.40
codegen_flags: <defaults>
</compile_context>

<pallas_src>
import jax
import jax.numpy as jnp
from jax.experimental import pallas as pl
from jax.experimental.pallas import tpu as pltpu

LN_EPS = 1e-5  # PyTorch nn.LayerNorm default


def _layernorm(x, gamma, beta):
    mean = jnp.mean(x, axis=-1, keepdims=True)
    d = x - mean
    var = jnp.mean(d * d, axis=-1, keepdims=True)
    return d * jax.lax.rsqrt(var + LN_EPS) * gamma + beta


def ffn_kernel(x_ref, w1_ref, b1_ref, g1_ref, be1_ref,
               w2_ref, b2_ref, g2_ref, be2_ref, alpha_ref, o_ref):
    x = x_ref[...]                                    # (tm, F) f32
    # hoist the broadcast row vectors once (JAX does not CSE broadcast_in_dim)
    b1 = b1_ref[...]; g1 = g1_ref[...]; be1 = be1_ref[...]
    b2 = b2_ref[...]; g2 = g2_ref[...]; be2 = be2_ref[...]
    alpha = alpha_ref[0]                              # SMEM scalar

    # linear1 on the MXU: weight-dtype operands, f32 accumulation
    h = jnp.dot(x.astype(w1_ref.dtype), w1_ref[...],
                preferred_element_type=jnp.float32) + b1
    # LayerNorm over hidden dim (f32), then ReLU; dropout = identity in eval
    h = _layernorm(h, g1, be1)
    h = jnp.maximum(h, 0.0)

    # linear2 on the MXU: weight-dtype operands, f32 accumulation
    y = jnp.dot(h.astype(w2_ref.dtype), w2_ref[...],
                preferred_element_type=jnp.float32) + b2

    # residual with learnable scalar alpha, LayerNorm over feature dim (f32)
    y = x + alpha * y
    o_ref[...] = _layernorm(y, g2, be2).astype(o_ref.dtype)


def _round_up(n, m):
    return ((n + m - 1) // m) * m


def _tpu_generation():
    try:
        kind = jax.devices()[0].device_kind.lower()
    except Exception:
        return 6
    for g in (7, 6, 5, 4):
        if f"v{g}" in kind:
            return g
    return 6


def _vmem_capacity_bytes(gen):
    try:
        cap = getattr(pltpu.get_tpu_info(), "vmem_capacity_bytes", None)
        if cap:
            return int(cap)
    except Exception:
        pass
    return (64 if gen >= 7 else 128) * (2 ** 20)


def feed_forward(x, params, *, tm=None):
    """x: (N, F) float32; params as produced by init_params."""
    N, F = x.shape
    H = params["w1"].shape[1]
    gen = _tpu_generation()

    # Row tile: v5e's 4x128^2 MXU is full at 128 rows; 256 fills v6e/v7x.
    if tm is None:
        tm = 128 if gen <= 5 else 256
    # Multiple of 16 (bf16 sublane packing), never larger than the padded input.
    tm = max(16, _round_up(tm, 16))
    tm = min(tm, _round_up(N, 16))
    # v7x has two TensorCores: make sure the 'parallel' grid axis has >= 2 steps.
    if gen >= 7 and pl.cdiv(N, tm) < 2 and N > 16:
        tm = max(16, _round_up(pl.cdiv(N, 2), 16))
    Np = _round_up(N, tm)
    x_p = x if Np == N else jnp.pad(x, ((0, Np - N), (0, 0)))
    n_steps = Np // tm
    grid = (n_steps,)

    const = lambda i: (0, 0)          # weights / biases / LN params: resident
    rows = lambda i: (i, 0)           # row-tiled activations

    wdtype = params["w1"].dtype
    wbytes = jnp.dtype(wdtype).itemsize

    # Constant-index blocks: fetch once, single buffer (halves weight VMEM).
    single = pl.Buffered(1)
    # Streamed x tiles: 3-deep when the grid is long enough (HBM-bound regime).
    x_bufs = 3 if n_steps >= 3 else 2
    x_spec = (pl.BlockSpec((tm, F), rows, pipeline_mode=pl.Buffered(3))
              if x_bufs == 3 else pl.BlockSpec((tm, F), rows))

    # VMEM working set (weights single-buffered) -> scoped limit, per-gen cap.
    est = ((F * H + H * F) * wbytes            # W1 + W2, 1 pipeline buffer
           + (3 * H + 3 * F) * 4               # bias / LN row vectors, f32
           + x_bufs * tm * F * 4               # x tiles
           + 2 * tm * F * 4                    # out tiles (double-buffered)
           + 2 * tm * H * 4)                   # f32 hidden + relayout scratch
    slack = 1.3 if gen >= 7 else 2.0
    cap = int(0.75 * _vmem_capacity_bytes(gen))      # ~48 MiB on v7x, 96 MiB else
    vmem_limit = int(min(max(slack * est, 32 * 2**20), cap))

    cost = pl.CostEstimate(
        flops=4 * Np * F * H,                  # two row-tile matmuls
        transcendentals=2 * Np,                # one rsqrt per row per LayerNorm
        bytes_accessed=(2 * Np * F * 4         # x in + out
                        + (F * H + H * F) * wbytes
                        + (3 * H + 3 * F) * 4),
    )

    out = pl.pallas_call(
        ffn_kernel,
        out_shape=jax.ShapeDtypeStruct((Np, F), x.dtype),
        grid=grid,
        in_specs=[
            x_spec,                                                   # x
            pl.BlockSpec((F, H), const, pipeline_mode=single),        # w1
            pl.BlockSpec((1, H), const, pipeline_mode=single),        # b1
            pl.BlockSpec((1, H), const, pipeline_mode=single),        # ln1 gamma
            pl.BlockSpec((1, H), const, pipeline_mode=single),        # ln1 beta
            pl.BlockSpec((H, F), const, pipeline_mode=single),        # w2
            pl.BlockSpec((1, F), const, pipeline_mode=single),        # b2
            pl.BlockSpec((1, F), const, pipeline_mode=single),        # ln2 gamma
            pl.BlockSpec((1, F), const, pipeline_mode=single),        # ln2 beta
            pl.BlockSpec(memory_space=pltpu.MemorySpace.SMEM),        # alpha
        ],
        # F equal to the full array dim keeps this legal for any F; F % 128 == 0
        # additionally keeps the stores lane-dense (unmasked vst).
        out_specs=pl.BlockSpec((tm, F), rows),
        compiler_params=pltpu.CompilerParams(
            dimension_semantics=("parallel",),
            vmem_limit_bytes=vmem_limit),
        cost_estimate=cost,
    )(x_p, params["w1"], params["b1"], params["ln1_g"], params["ln1_b"],
      params["w2"], params["b2"], params["ln2_g"], params["ln2_b"],
      params["alpha"])

    return out if Np == N else out[:N]


def init_params(key, n_feature, n_hidden, weight_dtype=jnp.bfloat16):
    k1, k2, k3, k4 = jax.random.split(key, 4)
    # deterministic small-scale init (synthetic weights, not a checkpoint)
    s1 = 1.0 / jnp.sqrt(jnp.float32(n_feature))
    s2 = 1.0 / jnp.sqrt(jnp.float32(n_hidden))
    return {
        # weights stored in weight_dtype (bf16 MXU inputs); accumulation is f32
        "w1": jax.random.uniform(k1, (n_feature, n_hidden), jnp.float32,
                                 -s1, s1).astype(weight_dtype),
        "b1": jax.random.uniform(k2, (1, n_hidden), jnp.float32, -s1, s1),
        "w2": jax.random.uniform(k3, (n_hidden, n_feature), jnp.float32,
                                 -s2, s2).astype(weight_dtype),
        "b2": jax.random.uniform(k4, (1, n_feature), jnp.float32, -s2, s2),
        "ln1_g": jnp.ones((1, n_hidden), jnp.float32),
        "ln1_b": jnp.zeros((1, n_hidden), jnp.float32),
        "ln2_g": jnp.ones((1, n_feature), jnp.float32),
        "ln2_b": jnp.zeros((1, n_feature), jnp.float32),
        # matches the PyTorch module init (nn.Parameter(torch.zeros(1)))
        "alpha": jnp.zeros((1,), jnp.float32),
    }


def feed_forward_ref(x, p):
    # reference uses the same weight dtype / f32 accumulation as the kernel
    h = jnp.dot(x.astype(p["w1"].dtype), p["w1"],
                preferred_element_type=jnp.float32) + p["b1"]
    h = _layernorm(h, p["ln1_g"], p["ln1_b"])
    h = jnp.maximum(h, 0.0)
    y = jnp.dot(h.astype(p["w2"].dtype), p["w2"],
                preferred_element_type=jnp.float32) + p["b2"]
    y = x + p["alpha"][0] * y
    return _layernorm(y, p["ln2_g"], p["ln2_b"])


if __name__ == "__main__":
    # small shapes: batch=2, seq=8, n_feature=128 -> n_hidden = 4*128 = 512
    B, S, F = 2, 8, 128
    H = 4 * F

    key = jax.random.PRNGKey(0)
    kx, kp = jax.random.split(key)
    x = jax.random.normal(kx, (B, S, F), jnp.float32)
    params = init_params(kp, F, H)
    # PyTorch initializes alpha to 0; override to 0.5 so the residual branch is
    # exercised numerically (alpha=0 would hide second-matmul errors).
    params = dict(params, alpha=jnp.full((1,), 0.5, jnp.float32))

    x2d = x.reshape(B * S, F)                 # layout: (N, F), N = B*S
    out = feed_forward(x2d, params)           # tm auto-clamps to 16 rows here
    out = jax.block_until_ready(out).reshape(B, S, F)

    ref = feed_forward_ref(x2d, params).reshape(B, S, F)
    assert out.shape == (B, S, F)
    assert jnp.allclose(out, ref, atol=2e-3, rtol=2e-3)

    # also exercise the cdiv/padded-tile path (N=20 is not a multiple of 16)
    x_odd = jax.random.normal(jax.random.PRNGKey(1), (20, F), jnp.float32)
    out_odd = jax.block_until_ready(feed_forward(x_odd, params))
    ref_odd = feed_forward_ref(x_odd, params)
    assert out_odd.shape == (20, F)
    assert jnp.allclose(out_odd, ref_odd, atol=2e-3, rtol=2e-3)

    print("KERNEL_OK")
</pallas_src>

<mosaic_0001>
module attributes {stable_mosaic.version = 11 : i64} {
  func.func @ffn_kernel(%arg0: i32, %arg1: memref<16x128xf32, #tpu.memory_space<vmem>>, %arg2: memref<128x512xbf16, #tpu.memory_space<vmem>>, %arg3: memref<1x512xf32, #tpu.memory_space<vmem>>, %arg4: memref<1x512xf32, #tpu.memory_space<vmem>>, %arg5: memref<1x512xf32, #tpu.memory_space<vmem>>, %arg6: memref<512x128xbf16, #tpu.memory_space<vmem>>, %arg7: memref<1x128xf32, #tpu.memory_space<vmem>>, %arg8: memref<1x128xf32, #tpu.memory_space<vmem>>, %arg9: memref<1x128xf32, #tpu.memory_space<vmem>>, %arg10: memref<1xf32, #tpu.memory_space<smem>>, %arg11: memref<16x128xf32, #tpu.memory_space<vmem>>) attributes {dimension_semantics = [#tpu.dimension_semantics<parallel>], iteration_bounds = array<i64: 1>, scalar_prefetch = 0 : i64, scratch_operands = 0 : i64, tpu.core_type = #tpu.core_type<tc>, window_params = [{transform_indices = @transform_0, window_bounds = array<i64: 16, 128>}, {pipeline_mode = #tpu.pipeline_mode<synchronous>, transform_indices = @transform_1, window_bounds = array<i64: 128, 512>}, {pipeline_mode = #tpu.pipeline_mode<synchronous>, transform_indices = @transform_2, window_bounds = array<i64: 1, 512>}, {pipeline_mode = #tpu.pipeline_mode<synchronous>, transform_indices = @transform_3, window_bounds = array<i64: 1, 512>}, {pipeline_mode = #tpu.pipeline_mode<synchronous>, transform_indices = @transform_4, window_bounds = array<i64: 1, 512>}, {pipeline_mode = #tpu.pipeline_mode<synchronous>, transform_indices = @transform_5, window_bounds = array<i64: 512, 128>}, {pipeline_mode = #tpu.pipeline_mode<synchronous>, transform_indices = @transform_6, window_bounds = array<i64: 1, 128>}, {pipeline_mode = #tpu.pipeline_mode<synchronous>, transform_indices = @transform_7, window_bounds = array<i64: 1, 128>}, {pipeline_mode = #tpu.pipeline_mode<synchronous>, transform_indices = @transform_8, window_bounds = array<i64: 1, 128>}, {transform_indices = @transform_9, window_bounds = array<i64: 1>}, {transform_indices = @transform_10, window_bounds = array<i64: 16, 128>}]} {
    %c0 = arith.constant 0 : index
    %c0_0 = arith.constant 0 : index
    %0 = vector.load %arg1[%c0, %c0_0] : memref<16x128xf32, #tpu.memory_space<vmem>>, vector<16x128xf32>
    %c0_1 = arith.constant 0 : index
    %c0_2 = arith.constant 0 : index
    %1 = vector.load %arg3[%c0_1, %c0_2] : memref<1x512xf32, #tpu.memory_space<vmem>>, vector<1x512xf32>
    %c0_3 = arith.constant 0 : index
    %c0_4 = arith.constant 0 : index
    %2 = vector.load %arg4[%c0_3, %c0_4] : memref<1x512xf32, #tpu.memory_space<vmem>>, vector<1x512xf32>
    %c0_5 = arith.constant 0 : index
    %c0_6 = arith.constant 0 : index
    %3 = vector.load %arg5[%c0_5, %c0_6] : memref<1x512xf32, #tpu.memory_space<vmem>>, vector<1x512xf32>
    %c0_7 = arith.constant 0 : index
    %c0_8 = arith.constant 0 : index
    %4 = vector.load %arg7[%c0_7, %c0_8] : memref<1x128xf32, #tpu.memory_space<vmem>>, vector<1x128xf32>
    %c0_9 = arith.constant 0 : index
    %c0_10 = arith.constant 0 : index
    %5 = vector.load %arg8[%c0_9, %c0_10] : memref<1x128xf32, #tpu.memory_space<vmem>>, vector<1x128xf32>
    %c0_11 = arith.constant 0 : index
    %c0_12 = arith.constant 0 : index
    %6 = vector.load %arg9[%c0_11, %c0_12] : memref<1x128xf32, #tpu.memory_space<vmem>>, vector<1x128xf32>
    %c0_13 = arith.constant 0 : index
    %7 = memref.load %arg10[%c0_13] : memref<1xf32, #tpu.memory_space<smem>>
    %8 = arith.truncf %0 : vector<16x128xf32> to vector<16x128xbf16>
    %c0_14 = arith.constant 0 : index
    %c0_15 = arith.constant 0 : index
    %9 = vector.load %arg2[%c0_14, %c0_15] : memref<128x512xbf16, #tpu.memory_space<vmem>>, vector<128x512xbf16>
    %cst = arith.constant dense<0.000000e+00> : vector<16x512xf32>
    %10 = tpu.matmul %8, %9, %cst {dimension_numbers = #tpu.dot_dimension_numbers<[1], [0], [0], [1], [0, 0, 1, 1], [], []>} : vector<16x128xbf16>, vector<128x512xbf16>, vector<16x512xf32> -> vector<16x512xf32>
    %11 = vector.broadcast %1 : vector<1x512xf32> to vector<16x512xf32>
    %12 = arith.addf %10, %11 : vector<16x512xf32>
    %cst_16 = arith.constant dense<0.000000e+00> : vector<16xf32>
    %13 = vector.multi_reduction <add>, %12, %cst_16 [1] : vector<16x512xf32> to vector<16xf32>
    %14 = vector.shape_cast %13 : vector<16xf32> to vector<16x1xf32>
    %cst_17 = arith.constant 5.120000e+02 : f32
    %15 = vector.broadcast %cst_17 : f32 to vector<16x1xf32>
    %16 = arith.divf %14, %15 : vector<16x1xf32>
    %17 = vector.broadcast %16 : vector<16x1xf32> to vector<16x512xf32>
    %18 = arith.subf %12, %17 : vector<16x512xf32>
    %19 = arith.mulf %18, %18 : vector<16x512xf32>
    %cst_18 = arith.constant dense<0.000000e+00> : vector<16xf32>
    %20 = vector.multi_reduction <add>, %19, %cst_18 [1] : vector<16x512xf32> to vector<16xf32>
    %21 = vector.shape_cast %20 : vector<16xf32> to vector<16x1xf32>
    %cst_19 = arith.constant 5.120000e+02 : f32
    %22 = vector.broadcast %cst_19 : f32 to vector<16x1xf32>
    %23 = arith.divf %21, %22 : vector<16x1xf32>
    %cst_20 = arith.constant 9.99999974E-6 : f32
    %24 = vector.broadcast %cst_20 : f32 to vector<16x1xf32>
    %25 = arith.addf %23, %24 : vector<16x1xf32>
    %26 = math.rsqrt %25 : vector<16x1xf32>
    %27 = vector.broadcast %26 : vector<16x1xf32> to vector<16x512xf32>
    %28 = arith.mulf %18, %27 : vector<16x512xf32>
    %29 = vector.broadcast %2 : vector<1x512xf32> to vector<16x512xf32>
    %30 = arith.mulf %28, %29 : vector<16x512xf32>
    %31 = vector.broadcast %3 : vector<1x512xf32> to vector<16x512xf32>
    %32 = arith.addf %30, %31 : vector<16x512xf32>
    %cst_21 = arith.constant 0.000000e+00 : f32
    %33 = vector.broadcast %cst_21 : f32 to vector<16x512xf32>
    %34 = arith.maximumf %32, %33 : vector<16x512xf32>
    %35 = arith.truncf %34 : vector<16x512xf32> to vector<16x512xbf16>
    %c0_22 = arith.constant 0 : index
    %c0_23 = arith.constant 0 : index
    %36 = vector.load %arg6[%c0_22, %c0_23] : memref<512x128xbf16, #tpu.memory_space<vmem>>, vector<512x128xbf16>
    %cst_24 = arith.constant dense<0.000000e+00> : vector<16x128xf32>
    %37 = tpu.matmul %35, %36, %cst_24 {dimension_numbers = #tpu.dot_dimension_numbers<[1], [0], [0], [1], [0, 0, 1, 1], [], []>} : vector<16x512xbf16>, vector<512x128xbf16>, vector<16x128xf32> -> vector<16x128xf32>
    %38 = vector.broadcast %4 : vector<1x128xf32> to vector<16x128xf32>
    %39 = arith.addf %37, %38 : vector<16x128xf32>
    %40 = vector.broadcast %7 : f32 to vector<16x128xf32>
    %41 = arith.mulf %40, %39 : vector<16x128xf32>
    %42 = arith.addf %0, %41 : vector<16x128xf32>
    %cst_25 = arith.constant dense<0.000000e+00> : vector<16xf32>
    %43 = vector.multi_reduction <add>, %42, %cst_25 [1] : vector<16x128xf32> to vector<16xf32>
    %44 = vector.shape_cast %43 : vector<16xf32> to vector<16x1xf32>
    %cst_26 = arith.constant 1.280000e+02 : f32
    %45 = vector.broadcast %cst_26 : f32 to vector<16x1xf32>
    %46 = arith.divf %44, %45 : vector<16x1xf32>
    %47 = vector.broadcast %46 : vector<16x1xf32> to vector<16x128xf32>
    %48 = arith.subf %42, %47 : vector<16x128xf32>
    %49 = arith.mulf %48, %48 : vector<16x128xf32>
    %cst_27 = arith.constant dense<0.000000e+00> : vector<16xf32>
    %50 = vector.multi_reduction <add>, %49, %cst_27 [1] : vector<16x128xf32> to vector<16xf32>
    %51 = vector.shape_cast %50 : vector<16xf32> to vector<16x1xf32>
    %cst_28 = arith.constant 1.280000e+02 : f32
    %52 = vector.broadcast %cst_28 : f32 to vector<16x1xf32>
    %53 = arith.divf %51, %52 : vector<16x1xf32>
    %cst_29 = arith.constant 9.99999974E-6 : f32
    %54 = vector.broadcast %cst_29 : f32 to vector<16x1xf32>
    %55 = arith.addf %53, %54 : vector<16x1xf32>
    %56 = math.rsqrt %55 : vector<16x1xf32>
    %57 = vector.broadcast %56 : vector<16x1xf32> to vector<16x128xf32>
    %58 = arith.mulf %48, %57 : vector<16x128xf32>
    %59 = vector.broadcast %5 : vector<1x128xf32> to vector<16x128xf32>
    %60 = arith.mulf %58, %59 : vector<16x128xf32>
    %61 = vector.broadcast %6 : vector<1x128xf32> to vector<16x128xf32>
    %62 = arith.addf %60, %61 : vector<16x128xf32>
    %c0_30 = arith.constant 0 : index
    %c0_31 = arith.constant 0 : index
    %63 = vector.load %arg11[%c0_30, %c0_31] : memref<16x128xf32, #tpu.memory_space<vmem>>, vector<16x128xf32>
    tpu.vector_store %arg11[%c0_30, %c0_31], %62 {strides = array<i32>} : memref<16x128xf32, #tpu.memory_space<vmem>>, vector<16x128xf32>,
    return
  }
  func.func @transform_0(%arg0: i32) -> (i32, i32) {
    %c0_i32 = arith.constant 0 : i32
    %c0_i32_0 = arith.constant 0 : i32
    return %arg0, %c0_i32 : i32, i32
  }
  func.func @transform_1(%arg0: i32) -> (i32, i32) {
    %c0_i32 = arith.constant 0 : i32
    %c0_i32_0 = arith.constant 0 : i32
    %c0_i32_1 = arith.constant 0 : i32
    return %c0_i32, %c0_i32_0 : i32, i32
  }
  func.func @transform_2(%arg0: i32) -> (i32, i32) {
    %c0_i32 = arith.constant 0 : i32
    %c0_i32_0 = arith.constant 0 : i32
    %c0_i32_1 = arith.constant 0 : i32
    return %c0_i32, %c0_i32_0 : i32, i32
  }
  func.func @transform_3(%arg0: i32) -> (i32, i32) {
    %c0_i32 = arith.constant 0 : i32
    %c0_i32_0 = arith.constant 0 : i32
    %c0_i32_1 = arith.constant 0 : i32
    return %c0_i32, %c0_i32_0 : i32, i32
  }
  func.func @transform_4(%arg0: i32) -> (i32, i32) {
    %c0_i32 = arith.constant 0 : i32
    %c0_i32_0 = arith.constant 0 : i32
    %c0_i32_1 = arith.constant 0 : i32
    return %c0_i32, %c0_i32_0 : i32, i32
  }
  func.func @transform_5(%arg0: i32) -> (i32, i32) {
    %c0_i32 = arith.constant 0 : i32
    %c0_i32_0 = arith.constant 0 : i32
    %c0_i32_1 = arith.constant 0 : i32
    return %c0_i32, %c0_i32_0 : i32, i32
  }
  func.func @transform_6(%arg0: i32) -> (i32, i32) {
    %c0_i32 = arith.constant 0 : i32
    %c0_i32_0 = arith.constant 0 : i32
    %c0_i32_1 = arith.constant 0 : i32
    return %c0_i32, %c0_i32_0 : i32, i32
  }
  func.func @transform_7(%arg0: i32) -> (i32, i32) {
    %c0_i32 = arith.constant 0 : i32
    %c0_i32_0 = arith.constant 0 : i32
    %c0_i32_1 = arith.constant 0 : i32
    return %c0_i32, %c0_i32_0 : i32, i32
  }
  func.func @transform_8(%arg0: i32) -> (i32, i32) {
    %c0_i32 = arith.constant 0 : i32
    %c0_i32_0 = arith.constant 0 : i32
    %c0_i32_1 = arith.constant 0 : i32
    return %c0_i32, %c0_i32_0 : i32, i32
  }
  func.func @transform_9(%arg0: i32) -> i32 {
    %c0_i32 = arith.constant 0 : i32
    %c0_i32_0 = arith.constant 0 : i32
    return %c0_i32 : i32
  }
  func.func @transform_10(%arg0: i32) -> (i32, i32) {
    %c0_i32 = arith.constant 0 : i32
    %c0_i32_0 = arith.constant 0 : i32
    return %arg0, %c0_i32 : i32, i32
  }
}

</mosaic_0001>

<bundles_post_ra>
// kernel: tpu_custom_call.1
= control target key start
LH: loop header
LB: loop body
LE: loop exit
PB: predicated region body
PF: predicated region fallthrough
CT: control target
= control target key end

     0   :  { %16 = vsyncpa [#allocation4], 0  ;;  %s1425_s0 = inlined_call_operand.hbm [shape: f32[16,128], index: 0, kind: input, shape index: {}]   ;;  %s1426_s1 = inlined_call_operand.hbm [shape: bf16[128,512], index: 1, kind: input, shape index: {}]   ;;  %s1427_s2 = inlined_call_operand.vmem [shape: f32[1,512], index: 2, kind: input, shape index: {}]   ;;  %s1428_s3 = inlined_call_operand.hbm [shape: f32[1,512], index: 3, kind: input, shape index: {}]   ;;  %s1429_s4 = inlined_call_operand.vmem [shape: f32[1,512], index: 4, kind: input, shape index: {}]   ;;  %s1430_s5 = inlined_call_operand.hbm [shape: bf16[512,128], index: 5, kind: input, shape index: {}]   ;;  %s1431_s6 = inlined_call_operand.vmem [shape: f32[1,128], index: 6, kind: input, shape index: {}]   ;;  %s1432_s7 = inlined_call_operand.vmem [shape: f32[1,128], index: 7, kind: input, shape index: {}]   ;;  %s1433_s8 = inlined_call_operand.vmem [shape: f32[1,128], index: 8, kind: input, shape index: {}]   ;;  %s1434_s9 = inlined_call_operand.<no memory space> [shape: f32[1], index: 9, kind: input, shape index: {}]   ;;  %s1435_s10 = inlined_call_operand.hbm [shape: f32[16,128], index: 10, kind: output, shape index: {}]  }
   0x1   :  { %17 = vsyncpa [#allocation7], 0 }
   0x2   :  { %18 = vsyncpa [#allocation10], 0 }
   0x3   :  { %19 = vsyncpa [#allocation5], 0  ;;  %s1251_s13 = smov [#allocation6]  }
   0x4   :  { %s37_s14 = sshll.u32 %s1251_s13, 4  ;;  %s38_s14 = int_to_ptr.vmem [resolvable:$true] %s37_s14 }
   0x5   :  { %s1151_s15 = scalar_lea.vmem %s38_s14, 4096  ;;  %p1156_p1 = scmp.lt.s32.totalorder %s38_s14, %s38_s14 }
   0x6   :  { %p1152_p0 = scmp.ne.s32.totalorder %s38_s14, %s1151_s15  ;;  %p1157_p2 = scmp.lt.s32.totalorder %s1151_s15, %s1151_s15 }
   0x8   :  { %p1158_p3 = por %p1157_p2, %p1156_p1 }
   0xa   :  { %p1159_p4 = pnand %p1158_p3, %p1152_p0 }
   0xc   :  { %1162 = shalt.err (!%p1159_p4)
}
   0xd   :  { %s1252_s16 = smov 256   ;;  %s1253_s17 = smov 16  }
   0xe   :  { %43 = dma.hbm_to_vmem [thread:$0]  %s1426_s1, 4096, %s38_s14, [#allocation7], %s1252_s16, %s1252_s16, %s1253_s17  }
   0xf   :  { %s1254_s20 = smov [#allocation3]  }
  0x10   :  { %s25_s21 = sshll.u32 %s1254_s20, 4  ;;  %s26_s21 = int_to_ptr.vmem [resolvable:$true] %s25_s21 }
  0x11   :  { %s1171_s22 = scalar_lea.vmem %s26_s21, 256  ;;  %p1176_p6 = scmp.lt.s32.totalorder %s26_s21, %s26_s21 }
  0x12   :  { %p1172_p5 = scmp.ne.s32.totalorder %s26_s21, %s1171_s22  ;;  %p1177_p7 = scmp.lt.s32.totalorder %s1171_s22, %s1171_s22 }
  0x14   :  { %p1178_p8 = por %p1177_p7, %p1176_p6 }
  0x16   :  { %p1179_p9 = pnand %p1178_p8, %p1172_p5 }
  0x18   :  { %1182 = shalt.err (!%p1179_p9)
}
  0x19   :  { %s1255_s23 = smov 128   ;;  %s1256_s24 = smov 8  }
  0x1a   :  { %31 = dma.hbm_to_vmem [thread:$0]  %s1425_s0, 256, %s26_s21, [#allocation4], %s1255_s23, %s1255_s23, %s1256_s24  }
  0x1b   :  { %s1257_s1 = smov [#allocation8]   ;;  %s1258_s28 = smov [#allocation9]  }
  0x1c   :  { %s52_s27 = sshll.u32 %s1257_s1, 4  ;;  %s63_s29 = sshll.u32 %s1258_s28, 4  ;;  %s53_s27 = int_to_ptr.vmem [resolvable:$true] %s52_s27  ;;  %s64_s29 = int_to_ptr.vmem [resolvable:$true] %s63_s29 }
  0x1d   :  { %s1191_s30 = scalar_lea.vmem %s53_s27, 64  ;;  %p1196_p11 = scmp.lt.s32.totalorder %s53_s27, %s53_s27 }
  0x1e   :  { %p1192_p10 = scmp.ne.s32.totalorder %s53_s27, %s1191_s30  ;;  %p1197_p12 = scmp.lt.s32.totalorder %s1191_s30, %s1191_s30 }
  0x20   :  { %p1198_p13 = por %p1197_p12, %p1196_p11 }
  0x22   :  { %p1199_p0 = pnand %p1198_p13, %p1192_p10 }
  0x24   :  { %1202 = shalt.err (!%p1199_p0)
}
  0x25   :  { %55 = dma.hbm_to_vmem [thread:$0]  %s1428_s3, 64, %s53_s27, [#allocation7]  }
  0x26   :  { %s1211_s13 = scalar_lea.vmem %s64_s29, 4096  ;;  %p1216_p2 = scmp.lt.s32.totalorder %s64_s29, %s64_s29 }
  0x27   :  { %p1212_p1 = scmp.ne.s32.totalorder %s64_s29, %s1211_s13  ;;  %p1217_p3 = scmp.lt.s32.totalorder %s1211_s13, %s1211_s13 }
  0x29   :  { %p1218_p4 = por %p1217_p3, %p1216_p2 }
  0x2b   :  { %p1219_p5 = pnand %p1218_p4, %p1212_p1 }
  0x2d   :  { %1222 = shalt.err (!%p1219_p5)
}
  0x2e   :  { %s1259_s0 = smov 64   ;;  %s1260_s14 = smov 4  }
  0x2f   :  { %69 = dma.hbm_to_vmem [thread:$0]  %s1430_s5, 4096, %s64_s29, [#allocation10], %s1259_s0, %s1259_s0, %s1260_s14  }
  0x30   :  { %1243 = dma.done.wait [#allocation4], 256  }
  0x31   :  { %1244 = vsyncadd [#allocation4], 4294967040 }
  0x32   :  { %1245 = dma.done.wait [#allocation7], 4160  }
  0x33   :  { %1246 = vsyncadd [#allocation7], 4294963136 }
  0x34   :  { %1247 = dma.done.wait [#allocation10], 4096  }
  0x35   :  { %1248 = vsyncadd [#allocation10], 4294963200  ;;  %v1261_v0 = vmov 0   ;;  %v1055_v1 = vld [vmem:[#allocation6 + $0xe4] ss:$16 sps:$4 sm:$0xff]   ;;  %v1335_v34 = vld [vmem:[#allocation3 + $0x8] sm:$0xff]  ;;  %v134_v36 = vlaneseq }
  0x36   :  { %346 = vmatprep.mubr.bf16.mxu0 %v1261_v0  ;;  %389 = vmatprep.mubr.bf16.mxu1 %v1261_v0  ;;  %v1057_v2 = vld [vmem:[#allocation6 + $0xec] ss:$16 sps:$4 sm:$0xff]   ;;  %v1059_v3 = vld [vmem:[#allocation6 + $0xe0] ss:$16 sps:$4 sm:$0xff]   ;;  %v1060_v4 = vld [vmem:[#allocation6 + $0xe8] ss:$16 sps:$4 sm:$0xff]  }
  0x37   :  { %314 = vmatprep.subr.bf16.mxu0 %v1055_v1  ;;  %357 = vmatprep.subr.bf16.mxu1 %v1057_v2  ;;  %v1061_v5 = vld [vmem:[#allocation6 + $0xc4] ss:$16 sps:$4 sm:$0xff]   ;;  %v1063_v6 = vld [vmem:[#allocation6 + $0xcc] ss:$16 sps:$4 sm:$0xff]   ;;  %v1065_v7 = vld [vmem:[#allocation6 + $0xc0] ss:$16 sps:$4 sm:$0xff]  }
  0x38   :  { %315 = vmatpush1.bf16.msra.mxu0 %v1059_v3  ;;  %358 = vmatpush1.bf16.msra.mxu1 %v1060_v4  ;;  %v1066_v8 = vld [vmem:[#allocation6 + $0xc8] ss:$16 sps:$4 sm:$0xff]   ;;  %v1067_v9 = vld [vmem:[#allocation6 + $0xa4] ss:$16 sps:$4 sm:$0xff]   ;;  %v1069_v10 = vld [vmem:[#allocation6 + $0xac] ss:$16 sps:$4 sm:$0xff]  }
  0x39   :  { %316 = vmatprep.subr.bf16.mxu0 %v1061_v5  ;;  %359 = vmatprep.subr.bf16.mxu1 %v1063_v6  ;;  %v1071_v11 = vld [vmem:[#allocation6 + $0xa0] ss:$16 sps:$4 sm:$0xff]   ;;  %v1072_v12 = vld [vmem:[#allocation6 + $0xa8] ss:$16 sps:$4 sm:$0xff]   ;;  %v1073_v13 = vld [vmem:[#allocation6 + $0x84] ss:$16 sps:$4 sm:$0xff]  }
  0x3a   :  { %v1075_v14 = vld [vmem:[#allocation6 + $0x8c] ss:$16 sps:$4 sm:$0xff]   ;;  %v1077_v15 = vld [vmem:[#allocation6 + $0x80] ss:$16 sps:$4 sm:$0xff]   ;;  %v1078_v16 = vld [vmem:[#allocation6 + $0x88] ss:$16 sps:$4 sm:$0xff]  }
  0x3b   :  { %v1079_v17 = vld [vmem:[#allocation6 + $0x64] ss:$16 sps:$4 sm:$0xff]   ;;  %v1081_v18 = vld [vmem:[#allocation6 + $0x6c] ss:$16 sps:$4 sm:$0xff]   ;;  %v1083_v19 = vld [vmem:[#allocation6 + $0x60] ss:$16 sps:$4 sm:$0xff]  }
  0x3c   :  { %317 = vmatpush1.bf16.msra.mxu0 %v1065_v7  ;;  %360 = vmatpush1.bf16.msra.mxu1 %v1066_v8  ;;  %v1084_v20 = vld [vmem:[#allocation6 + $0x68] ss:$16 sps:$4 sm:$0xff]   ;;  %v1085_v21 = vld [vmem:[#allocation6 + $0x44] ss:$16 sps:$4 sm:$0xff]   ;;  %v1087_v22 = vld [vmem:[#allocation6 + $0x4c] ss:$16 sps:$4 sm:$0xff]  }
  0x3d   :  { %318 = vmatprep.subr.bf16.mxu0 %v1067_v9  ;;  %361 = vmatprep.subr.bf16.mxu1 %v1069_v10  ;;  %v1089_v23 = vld [vmem:[#allocation6 + $0x40] ss:$16 sps:$4 sm:$0xff]   ;;  %v1090_v24 = vld [vmem:[#allocation6 + $0x48] ss:$16 sps:$4 sm:$0xff]   ;;  %v1091_v25 = vld [vmem:[#allocation6 + $0x24] ss:$16 sps:$4 sm:$0xff]  }
  0x3e   :  { %v1093_v26 = vld [vmem:[#allocation6 + $0x2c] ss:$16 sps:$4 sm:$0xff]   ;;  %v1095_v27 = vld [vmem:[#allocation6 + $0x20] ss:$16 sps:$4 sm:$0xff]   ;;  %v1096_v28 = vld [vmem:[#allocation6 + $0x28] ss:$16 sps:$4 sm:$0xff]  }
  0x3f   :  { %v1097_v29 = vld [vmem:[#allocation6 + $0x4] ss:$16 sps:$4 sm:$0xff]   ;;  %v1099_v30 = vld [vmem:[#allocation6 + $0xc] ss:$16 sps:$4 sm:$0xff]   ;;  %v1101_v31 = vld [vmem:[#allocation6] ss:$16 sps:$4 sm:$0xff]  }
  0x40   :  { %319 = vmatpush1.bf16.msra.mxu0 %v1071_v11  ;;  %362 = vmatpush1.bf16.msra.mxu1 %v1072_v12  ;;  %v1102_v32 = vld [vmem:[#allocation6 + $0x8] ss:$16 sps:$4 sm:$0xff]   ;;  %v1333_v33 = vld [vmem:[#allocation3] sm:$0xff]  ;;  %v135_v37 = vshrl.u32 %v134_v36, 7  ;;  %v1106_v36 = vld [vmem:[#allocation9 + $0xb8] sm:$0xff]   ;;  %s1262_s25 = smov [#allocation11]  }
  0x41   :  { %320 = vmatprep.subr.bf16.mxu0 %v1073_v13  ;;  %363 = vmatprep.subr.bf16.mxu1 %v1075_v14  ;;  %v100_v35 = vpack.c.bf16 %v1335_v34, %v1333_v33  ;;  %v93_v41 = vld [vmem:[%s1427_s2] sm:$0xf]  ;;  %s918_s26 = sshll.u32 %s1262_s25, 4  ;;  %s919_s26 = int_to_ptr.vmem [resolvable:$true] %s918_s26 }
  0x42   :  { %v1339_v38 = vsub.s32 0, %v135_v37  ;;  %v1341_v39 = vsub.s32 2, %v135_v37  ;;  %v1343_v40 = vsub.s32 1, %v135_v37  ;;  %v1351_v45 = vsub.s32 3, %v135_v37  ;;  %v1107_v37 = vld [vmem:[#allocation9 + $0x70] sm:$0xff]   ;;  %s1223_s1 = scalar_lea.vmem %s919_s26, 256  ;;  %p1228_p7 = scmp.lt.s32.totalorder %s919_s26, %s919_s26 }
  0x43   :  { %p1224_p6 = scmp.ne.s32.totalorder %s919_s26, %s1223_s1  ;;  %p1229_p8 = scmp.lt.s32.totalorder %s1223_s1, %s1223_s1 }
  0x44   :  { %321 = vmatpush1.bf16.msra.mxu0 %v1077_v15  ;;  %364 = vmatpush1.bf16.msra.mxu1 %v1078_v16  ;;  %v137_v42 = vrot.slane %v93_v41, %v1339_v38  ;;  %v145_v43 = vrot.slane %v93_v41, %v1341_v39  ;;  %v141_v44 = vrot.slane %v93_v41, %v1343_v40 }
  0x45   :  { %322 = vmatprep.subr.bf16.mxu0 %v1079_v17  ;;  %365 = vmatprep.subr.bf16.mxu1 %v1081_v18  ;;  %v149_v53 = vrot.slane %v93_v41, %v1351_v45  ;;  %v1108_v41 = vld [vmem:[#allocation9 + $0xf0] sm:$0xff]   ;;  %p1230_p9 = por %p1229_p8, %p1228_p7 }
  0x47   :  { %p1231_p10 = pnand %p1230_p9, %p1224_p6 }
  0x48   :  { %323 = vmatpush1.bf16.msra.mxu0 %v1083_v19  ;;  %366 = vmatpush1.bf16.msra.mxu1 %v1084_v20 }
  0x49   :  { %324 = vmatprep.subr.bf16.mxu0 %v1085_v21  ;;  %367 = vmatprep.subr.bf16.mxu1 %v1087_v22 }
  0x4c   :  { %325 = vmatpush1.bf16.msra.mxu0 %v1089_v23  ;;  %368 = vmatpush1.bf16.msra.mxu1 %v1090_v24 }
  0x4d   :  { %326 = vmatprep.subr.bf16.mxu0 %v1091_v25  ;;  %369 = vmatprep.subr.bf16.mxu1 %v1093_v26 }
  0x50   :  { %327 = vmatpush1.bf16.msra.mxu0 %v1095_v27  ;;  %370 = vmatpush1.bf16.msra.mxu1 %v1096_v28 }
  0x51   :  { %328 = vmatprep.subr.bf16.mxu0 %v1097_v29  ;;  %371 = vmatprep.subr.bf16.mxu1 %v1099_v30 }
  0x54   :  { %329 = vmatpush1.bf16.msra.mxu0 %v1101_v31  ;;  %372 = vmatpush1.bf16.msra.mxu1 %v1102_v32  ;;  %v1103_v31 = vld [vmem:[#allocation9 + $0x78] sm:$0xff]  }
  0x55   :  { %v1104_v32 = vld [vmem:[#allocation9 + $0xf8] sm:$0xff]   ;;  %999 = vmatprep.subr.bf16.mxu0 %v1103_v31 }
  0x56   :  { %1021 = vmatprep.subr.bf16.mxu1 %v1104_v32 }
  0x57   :  { %347 = vmatmul.mubr.bf16.vlgmr.msra.gmra.mxu0 %v100_v35  ;;  %390 = vmatmul.mubr.bf16.vlgmr.msra.gmra.mxu1 %v100_v35  ;;  %v1105_v35 = vld [vmem:[#allocation9 + $0x38] sm:$0xff]  }
  0x58   :  { %1000 = vmatpush3.bf16.msra.mxu0 %v1105_v35  ;;  %1022 = vmatpush3.bf16.msra.mxu1 %v1106_v36 }
  0x59   :  { %1001 = vmatprep.subr.bf16.mxu0 %v1107_v37  ;;  %1023 = vmatprep.subr.bf16.mxu1 %v1108_v41 }
 0x117   :  { %v348_v46 = vpop.f32.mrf.mxu0  ;;  %v391_v47 = vpop.f32.mrf.mxu1 }
 0x118   :  { %v349_v50 = vadd.f32 %v348_v46, %v137_v42  ;;  %v392_v51 = vadd.f32 %v391_v47, %v145_v43  ;;  %v1112_v46 = vld [vmem:[#allocation9 + $0xe8] sm:$0xff]  }
 0x119   :  { %v350_v48 = vpop.f32.mrf.mxu0  ;;  %v393_v49 = vpop.f32.mrf.mxu1  ;;  %v1113_v47 = vld [vmem:[#allocation9 + $0x28] sm:$0xff]  }
 0x11a   :  { %v351_v52 = vadd.f32 %v350_v48, %v141_v44  ;;  %v394_v58 = vadd.f32 %v393_v49, %v149_v53  ;;  %v1114_v48 = vld [vmem:[#allocation9 + $0xa8] sm:$0xff]   ;;  %v1115_v49 = vld [vmem:[#allocation9 + $0x60] sm:$0xff]  }
 0x11b   :  { %v352_v54 = vpop.f32.mrf.mxu0  ;;  %v395_v55 = vpop.f32.mrf.mxu1 }
 0x11c   :  { %v400_v56 = vadd.f32 %v351_v52, %v349_v50  ;;  %v353_v59 = vadd.f32 %v352_v54, %v137_v42  ;;  %v396_v63 = vadd.f32 %v395_v55, %v145_v43  ;;  %v1109_v42 = vld [vmem:[#allocation9 + $0x30] sm:$0xff]   ;;  %v1120_v54 = vld [vmem:[#allocation9 + $0xd8] sm:$0xff]  }
 0x11d   :  { %v354_v57 = vpop.f32.mrf.mxu0  ;;  %v397_v62 = vpop.f32.mrf.mxu1  ;;  %v1110_v43 = vld [vmem:[#allocation9 + $0xb0] sm:$0xff]   ;;  %1002 = vmatpush3.bf16.msra.mxu0 %v1109_v42  ;;  %v1121_v55 = vld [vmem:[#allocation9 + $0x18] sm:$0xff]  }
 0x11e   :  { %v355_v60 = vadd.f32 %v354_v57, %v141_v44  ;;  %v401_v61 = vadd.f32 %v400_v56, %v392_v51  ;;  %v398_v2 = vadd.f32 %v397_v62, %v149_v53  ;;  %1024 = vmatpush3.bf16.msra.mxu1 %v1110_v43  ;;  %v1111_v44 = vld [vmem:[#allocation9 + $0x68] sm:$0xff]   ;;  %v1119_v53 = vld [vmem:[#allocation9 + $0x58] sm:$0xff]   ;;  %v1123_v57 = vld [vmem:[#allocation9 + $0x50] sm:$0xff]  }
 0x11f   :  { %1003 = vmatprep.subr.bf16.mxu0 %v1111_v44  ;;  %1025 = vmatprep.subr.bf16.mxu1 %v1112_v46  ;;  %v1122_v56 = vld [vmem:[#allocation9 + $0x98] sm:$0xff]   ;;  %v1128_v62 = vld [vmem:[#allocation9 + $0xc8] sm:$0xff]  }
 0x120   :  { %v405_v0 = vadd.f32 %v355_v60, %v353_v59  ;;  %v402_v1 = vadd.f32 %v401_v61, %v394_v58  ;;  %v1127_v61 = vld [vmem:[#allocation9 + $0x48] sm:$0xff]  }
 0x121   :  { %1004 = vmatpush3.bf16.msra.mxu0 %v1113_v47 }
 0x122   :  { %403 = vadd.xlane.f32.xlu0 %v402_v1  ;;  %v406_v3 = vadd.f32 %v405_v0, %v396_v63  ;;  %1026 = vmatpush3.bf16.msra.mxu1 %v1114_v48  ;;  %v1130_v0 = vld [vmem:[#allocation9 + $0x88] sm:$0xff]   ;;  %v1131_v1 = vld [vmem:[#allocation9 + $0x40] sm:$0xff]  }
 0x123   :  { %1005 = vmatprep.subr.bf16.mxu0 %v1115_v49 }
 0x124   :  { %v407_v4 = vadd.f32 %v406_v3, %v398_v2  ;;  %v1133_v3 = vld [vmem:[#allocation9] sm:$0xff]  }
 0x126   :  { %408 = vadd.xlane.f32.xlu0 %v407_v4  ;;  %v1134_v4 = vld [vmem:[#allocation9 + $0x80] sm:$0xff]  }
 0x1ab   :  { %v404_v5 = vpop.xlane.xlu0 %403 }
 0x1ac   :  { %v411_v6 = vmul.f32 0.001953125, %v404_v5 }
 0x1ae   :  { %v1354_v7 = vsub.f32 %v349_v50, %v411_v6  ;;  %v1356_v8 = vsub.f32 %v351_v52, %v411_v6  ;;  %v1358_v9 = vsub.f32 %v392_v51, %v411_v6  ;;  %v1360_v11 = vsub.f32 %v394_v58, %v411_v6  ;;  %v1116_v50 = vld [vmem:[#allocation9 + $0xe0] sm:$0xff]   ;;  %v1124_v58 = vld [vmem:[#allocation9 + $0xd0] sm:$0xff]  }
 0x1af   :  { %v409_v10 = vpop.xlane.xlu0 %408  ;;  %v1117_v51 = vld [vmem:[#allocation9 + $0x20] sm:$0xff]   ;;  %1027 = vmatprep.subr.bf16.mxu1 %v1116_v50 }
 0x1b0   :  { %v412_v12 = vmul.f32 0.001953125, %v409_v10  ;;  %v421_v13 = vmul.f32 %v1354_v7, %v1354_v7  ;;  %v422_v14 = vmul.f32 %v1356_v8, %v1356_v8  ;;  %v423_v15 = vmul.f32 %v1358_v9, %v1358_v9  ;;  %v1118_v52 = vld [vmem:[#allocation9 + $0xa0] sm:$0xff]   ;;  %1006 = vmatpush3.bf16.msra.mxu0 %v1117_v51 }
 0x1b1   :  { %v424_v20 = vmul.f32 %v1360_v11, %v1360_v11  ;;  %1028 = vmatpush3.bf16.msra.mxu1 %v1118_v52  ;;  %1007 = vmatprep.subr.bf16.mxu0 %v1119_v53 }
 0x1b2   :  { %v1368_v16 = vsub.f32 %v353_v59, %v412_v12  ;;  %v1370_v17 = vsub.f32 %v355_v60, %v412_v12  ;;  %v429_v18 = vadd.f32 %v422_v14, %v421_v13  ;;  %v1372_v19 = vsub.f32 %v396_v63, %v412_v12  ;;  %1029 = vmatprep.subr.bf16.mxu1 %v1120_v54  ;;  %v1125_v59 = vld [vmem:[#allocation9 + $0x10] sm:$0xff]   ;;  %v1129_v63 = vld [vmem:[#allocation9 + $0x8] sm:$0xff]  }
 0x1b3   :  { %v1376_v22 = vsub.f32 %v398_v2, %v412_v12  ;;  %v1126_v60 = vld [vmem:[#allocation9 + $0x90] sm:$0xff]   ;;  %v1132_v2 = vld [vmem:[#allocation9 + $0xc0] sm:$0xff]  }
 0x1b4   :  { %v430_v21 = vadd.f32 %v429_v18, %v423_v15  ;;  %v425_v23 = vmul.f32 %v1368_v16, %v1368_v16  ;;  %v426_v24 = vmul.f32 %v1370_v17, %v1370_v17  ;;  %v427_v26 = vmul.f32 %v1372_v19, %v1372_v19  ;;  %1008 = vmatpush3.bf16.msra.mxu0 %v1121_v55  ;;  %v94_v15 = vld [vmem:[#allocation8] sm:$0xf] }
 0x1b5   :  { %v428_v28 = vmul.f32 %v1376_v22, %v1376_v22  ;;  %1030 = vmatpush3.bf16.msra.mxu1 %v1122_v56  ;;  %1009 = vmatprep.subr.bf16.mxu0 %v1123_v57  ;;  %v461_v18 = vrot.slane %v94_v15, %v1343_v40 }
 0x1b6   :  { %v431_v25 = vadd.f32 %v430_v21, %v424_v20  ;;  %v434_v27 = vadd.f32 %v426_v24, %v425_v23  ;;  %1031 = vmatprep.subr.bf16.mxu1 %v1124_v58  ;;  %v469_v20 = vrot.slane %v94_v15, %v1351_v45  ;;  %v95_v23 = vld [vmem:[%s1429_s4] sm:$0xf]  ;;  %v457_v24 = vrot.slane %v94_v15, %v1339_v38 }
 0x1b7   :  { %v490_v31 = vrot.slane %v95_v23, %v1343_v40  ;;  %v498_v35 = vrot.slane %v95_v23, %v1351_v45  ;;  %v486_v37 = vrot.slane %v95_v23, %v1339_v38  ;;  %v494_v41 = vrot.slane %v95_v23, %v1341_v39 }
 0x1b8   :  { %432 = vadd.xlane.f32.xlu1 %v431_v25  ;;  %v435_v29 = vadd.f32 %v434_v27, %v427_v26  ;;  %1010 = vmatpush3.bf16.msra.mxu0 %v1125_v59  ;;  %v465_v25 = vrot.slane %v94_v15, %v1341_v39 }
 0x1b9   :  { %1032 = vmatpush3.bf16.msra.mxu1 %v1126_v60  ;;  %1011 = vmatprep.subr.bf16.mxu0 %v1127_v61 }
 0x1ba   :  { %v436_v30 = vadd.f32 %v435_v29, %v428_v28  ;;  %1033 = vmatprep.subr.bf16.mxu1 %v1128_v62 }
 0x1bc   :  { %437 = vadd.xlane.f32.xlu1 %v436_v30  ;;  %1012 = vmatpush3.bf16.msra.mxu0 %v1129_v63  ;;  %v964_v63 = vld [vmem:[%s1431_s6] ss:$0 sm:$0xff] }
 0x1bd   :  { %1034 = vmatpush3.bf16.msra.mxu1 %v1130_v0  ;;  %1013 = vmatprep.subr.bf16.mxu0 %v1131_v1 }
 0x1be   :  { %1035 = vmatprep.subr.bf16.mxu1 %v1132_v2 }
 0x1c0   :  { %1014 = vmatpush3.bf16.msra.mxu0 %v1133_v3 }
 0x1c1   :  { %1036 = vmatpush3.bf16.msra.mxu1 %v1134_v4 }
 0x241   :  { %v433_v5 = vpop.xlane.xlu1 %432 }
 0x242   :  { %v439_v6 = vmul.f32 0.001953125, %v433_v5 }
 0x244   :  { %v441_v10 = vadd.f32 1e-05, %v439_v6 }
 0x245   :  { %v438_v12 = vpop.xlane.xlu1 %437 }
 0x246   :  { %1135 = vrsqrt.f32 %v441_v10  ;;  %v440_v13 = vmul.f32 0.001953125, %v438_v12 }
 0x248   :  { %v442_v14 = vadd.f32 1e-05, %v440_v13  ;;  %v867_v13 = vstv %s1434_s9 }
 0x24a   :  { %1137 = vrsqrt.f32 %v442_v14 }
 0x253   :  { %v1136_v21 = vpop.eup %1135 }
 0x254   :  { %v446_v26 = vmul.f32 %v1136_v21, %v1356_v8  ;;  %v448_v27 = vmul.f32 %v1136_v21, %v1360_v11  ;;  %v445_v28 = vmul.f32 %v1136_v21, %v1354_v7  ;;  %v447_v29 = vmul.f32 %v1136_v21, %v1358_v9 }
 0x256   :  { %v475_v30 = vmul.f32 %v461_v18, %v446_v26  ;;  %v477_v32 = vmul.f32 %v469_v20, %v448_v27  ;;  %v474_v42 = vmul.f32 %v457_v24, %v445_v28  ;;  %v476_v43 = vmul.f32 %v465_v25, %v447_v29 }
 0x257   :  { %v1138_v36 = vpop.eup %1137 }
 0x258   :  { %v450_v8 = vmul.f32 %v1138_v36, %v1370_v17  ;;  %v452_v11 = vmul.f32 %v1138_v36, %v1376_v22  ;;  %v449_v7 = vmul.f32 %v1138_v36, %v1368_v16  ;;  %v451_v9 = vmul.f32 %v1138_v36, %v1372_v19 }
 0x259   :  { %v504_v40 = vadd.f32 %v490_v31, %v475_v30  ;;  %v506_v47 = vadd.f32 %v498_v35, %v477_v32  ;;  %v503_v48 = vadd.f32 %v486_v37, %v474_v42  ;;  %v505_v38 = vadd.f32 %v494_v41, %v476_v43 }
 0x25a   :  { %v479_v44 = vmul.f32 %v461_v18, %v450_v8  ;;  %v481_v46 = vmul.f32 %v469_v20, %v452_v11  ;;  %v478_v45 = vmul.f32 %v457_v24, %v449_v7  ;;  %v480_v49 = vmul.f32 %v465_v25, %v451_v9  ;;  %v997_v11 = vld [vmem:[%s1432_s7] ss:$0 sm:$0xff] }
 0x25b   :  { %v512_v53 = vmax.f32 %v504_v40, 0.0  ;;  %v514_v54 = vmax.f32 %v506_v47, 0.0  ;;  %v511_v55 = vmax.f32 %v503_v48, 0.0  ;;  %v513_v56 = vmax.f32 %v505_v38, 0.0  ;;  %v998_v9 = vld [vmem:[%s1433_s8] ss:$0 sm:$0xff] }
 0x25c   :  { %v508_v50 = vadd.f32 %v490_v31, %v479_v44  ;;  %v510_v39 = vadd.f32 %v498_v35, %v481_v46  ;;  %v507_v51 = vadd.f32 %v486_v37, %v478_v45  ;;  %v509_v52 = vadd.f32 %v494_v41, %v480_v49 }
 0x25e   :  { %v516_v17 = vmax.f32 %v508_v50, 0.0  ;;  %v518_v22 = vmax.f32 %v510_v39, 0.0  ;;  %v515_v16 = vmax.f32 %v507_v51, 0.0  ;;  %v517_v19 = vmax.f32 %v509_v52, 0.0 }
 0x260   :  { %v520_v57 = vpack.c.bf16 %v516_v17, %v512_v53  ;;  %v522_v58 = vpack.c.bf16 %v518_v22, %v514_v54  ;;  %v519_v59 = vpack.c.bf16 %v515_v16, %v511_v55  ;;  %v521_v60 = vpack.c.bf16 %v517_v19, %v513_v56 }
 0x262   :  { %817 = vmatprep.mubr.bf16.mxu0 %v520_v57  ;;  %858 = vmatprep.mubr.bf16.mxu1 %v522_v58 }
 0x263   :  { %818 = vmatmul.mubr.bf16.vlgmr.msra.gmra.mxu0 %v519_v59  ;;  %859 = vmatmul.mubr.bf16.vlgmr.msra.gmra.mxu1 %v521_v60 }
 0x323   :  { %v1015_v61 = vpop.f32.mrf.mxu0  ;;  %v1037_v62 = vpop.f32.mrf.mxu1 }
 0x325   :  { %v1016_v0 = vpop.f32.mrf.mxu0  ;;  %v1038_v1 = vpop.f32.mrf.mxu1 }
 0x326   :  { %v1017_v2 = vadd.f32 %v1016_v0, %v1015_v61  ;;  %v1039_v6 = vadd.f32 %v1038_v1, %v1037_v62 }
 0x327   :  { %v1018_v3 = vpop.f32.mrf.mxu0  ;;  %v1040_v4 = vpop.f32.mrf.mxu1 }
 0x328   :  { %v820_v5 = vadd.f32 %v1017_v2, %v964_v63 }
 0x329   :  { %v1019_v10 = vpop.f32.mrf.mxu0  ;;  %v1041_v12 = vpop.f32.mrf.mxu1 }
 0x32a   :  { %v861_v14 = vadd.f32 %v1039_v6, %v820_v5  ;;  %v1020_v15 = vadd.f32 %v1019_v10, %v1018_v3  ;;  %v1042_v20 = vadd.f32 %v1041_v12, %v1040_v4 }
 0x32c   :  { %v823_v18 = vadd.f32 %v1020_v15, %v964_v63  ;;  %v868_v21 = vmul.f32 %v867_v13, %v861_v14 }
 0x32e   :  { %v864_v23 = vadd.f32 %v1042_v20, %v823_v18  ;;  %v870_v24 = vadd.f32 %v868_v21, %v1333_v33 }
 0x330   :  { %872 = vadd.xlane.f32.xlu0 %v870_v24  ;;  %v869_v25 = vmul.f32 %v867_v13, %v864_v23 }
 0x332   :  { %v871_v26 = vadd.f32 %v869_v25, %v1335_v34 }
 0x334   :  { %874 = vadd.xlane.f32.xlu1 %v871_v26 }
 0x3b9   :  { %v873_v27 = vpop.xlane.xlu0 %872 }
 0x3ba   :  { %v877_v28 = vmul.f32 0.0078125, %v873_v27 }
 0x3bc   :  { %v879_v29 = vsub.f32 %v870_v24, %v877_v28 }
 0x3bd   :  { %v875_v30 = vpop.xlane.xlu1 %874 }
 0x3be   :  { %v878_v31 = vmul.f32 0.0078125, %v875_v30  ;;  %v881_v32 = vmul.f32 %v879_v29, %v879_v29 }
 0x3c0   :  { %v880_v35 = vsub.f32 %v871_v26, %v878_v31  ;;  %883 = vadd.xlane.f32.xlu0 %v881_v32 }
 0x3c2   :  { %v882_v36 = vmul.f32 %v880_v35, %v880_v35 }
 0x3c4   :  { %885 = vadd.xlane.f32.xlu1 %v882_v36 }
 0x449   :  { %v884_v37 = vpop.xlane.xlu0 %883 }
 0x44a   :  { %v887_v41 = vmul.f32 0.0078125, %v884_v37 }
 0x44c   :  { %v889_v42 = vadd.f32 1e-05, %v887_v41 }
 0x44d   :  { %v886_v43 = vpop.xlane.xlu1 %885 }
 0x44e   :  { %1139 = vrsqrt.f32 %v889_v42  ;;  %v888_v33 = vmul.f32 0.0078125, %v886_v43 }
 0x450   :  { %v890_v8 = vadd.f32 1e-05, %v888_v33 }
 0x452   :  { %1141 = vrsqrt.f32 %v890_v8 }
 0x45b   :  { %v1140_v34 = vpop.eup %1139 }
 0x45c   :  { %v893_v7 = vmul.f32 %v1140_v34, %v879_v29 }
 0x45e   :  { %v901_v44 = vmul.f32 %v997_v11, %v893_v7 }
 0x45f   :  { %v1142_v40 = vpop.eup %1141 }
 0x460   :  { %v894_v46 = vmul.f32 %v1142_v40, %v880_v35  ;;  %v909_v47 = vadd.f32 %v998_v9, %v901_v44 }
 0x462   :  { %v902_v45 = vmul.f32 %v997_v11, %v894_v46  ;;  %911 = vst [vmem:[#allocation11] sm:$0xff] %v909_v47 }
 0x464   :  { %v910_v48 = vadd.f32 %v998_v9, %v902_v45 }
 0x466   :  { %912 = vst [vmem:[#allocation11 + $0x8] sm:$0xff] %v910_v48 }
 0x467   :  { %1234 = shalt.err (!%p1231_p10)
}
 0x468   :  { %924 = dma.vmem_to_hbm [thread:$0]  %s919_s26, 256, %s1435_s10, [#allocation5], %s1255_s23, %s1255_s23, %s1256_s24  }
 0x469   :  { %1249 = dma.done.wait [#allocation5], 256  }
 0x46a   :  { %1250 = vsyncadd [#allocation5], 4294967040 }
 0x46b   :  { %928 = vsyncpa [#allocation4], 1 }
 0x46c   :  { %929 = vsyncpa [#allocation7], 1 }
 0x46d   :  { %930 = vsyncpa [#allocation10], 1 }
 0x46e   :  { %931 = vsyncpa [#allocation5], 1 }

</bundles_post_ra>
